<compile_context>
chip_gen: v6e
topology: v6e:2x2x1
jax: 0.10.0
libtpu: 0.0.40
codegen_flags: <defaults>
</compile_context>

<pallas_src>
import math

import jax
import jax.numpy as jnp
from jax.experimental import pallas as pl
from jax.experimental.pallas import tpu as pltpu


# ----------------------------- Pallas kernel ------------------------------- #

def _mlp_block_kernel(x_ref, w_ref, b_ref, o_ref):
    """out = relu(x @ W + b) + x   for one (TM, D) row tile.

    x_ref : (TM, D)   input row tile (also the residual)
    w_ref : (D, D)    weight, already transposed to (in, out)
    b_ref : (1, D)    bias
    o_ref : (TM, D)   output row tile
    """
    x = x_ref[...]
    # Fused linear: single full-width MXU matmul with f32 accumulation.
    y = jnp.dot(x, w_ref[...], preferred_element_type=jnp.float32)
    y = y + b_ref[...].astype(jnp.float32)          # bias added once, post-matmul
    y = jnp.maximum(y, 0.0)                          # ReLU (VPU)
    # Dropout(p=0.0) / eval mode == identity.
    o_ref[...] = (y + x.astype(jnp.float32)).astype(o_ref.dtype)


# ----------------------------- wrapper -------------------------------------- #

def _round_up(v, m):
    return (v + m - 1) // m * m


def mlp_block(x, weight, bias, *, block_rows=256):
    """PyTorch-equivalent forward of MLP_Block (inference).

    x      : (..., dim)
    weight : (dim, dim)  -- PyTorch nn.Linear convention (out_features, in_features)
    bias   : (dim,)
    """
    orig_shape = x.shape
    dim = orig_shape[-1]
    x2 = x.reshape(-1, dim)
    M = x2.shape[0]

    # Lane-dense feature axis (multiple of 128) + sublane-aligned row tiles.
    d_pad = _round_up(dim, 128)
    tm = min(block_rows, _round_up(M, 8))
    tm = _round_up(tm, 8)
    m_pad = _round_up(M, tm)

    if m_pad != M or d_pad != dim:
        x2 = jnp.pad(x2, ((0, m_pad - M), (0, d_pad - dim)))

    w = jnp.transpose(weight)                        # (in, out) for x @ W
    b2 = bias.reshape(1, dim)
    if d_pad != dim:
        w = jnp.pad(w, ((0, d_pad - dim), (0, d_pad - dim)))
        b2 = jnp.pad(b2, ((0, 0), (0, d_pad - dim)))

    grid = (m_pad // tm,)

    out = pl.pallas_call(
        _mlp_block_kernel,
        out_shape=jax.ShapeDtypeStruct((m_pad, d_pad), x.dtype),
        grid=grid,
        in_specs=[
            pl.BlockSpec((tm, d_pad), lambda i: (i, 0)),       # x row tile
            pl.BlockSpec((d_pad, d_pad), lambda i: (0, 0)),    # weight (resident)
            pl.BlockSpec((1, d_pad), lambda i: (0, 0)),        # bias
        ],
        out_specs=pl.BlockSpec((tm, d_pad), lambda i: (i, 0)),
        compiler_params=pltpu.CompilerParams(
            dimension_semantics=("parallel",),
            vmem_limit_bytes=64 << 20,
        ),
    )(x2, w, b2)

    return out[:M, :dim].reshape(orig_shape)


# ----------------------------- parameters ---------------------------------- #

def init_params(key, dim):
    """Matches nn.Linear default init: U(-1/sqrt(dim), 1/sqrt(dim))."""
    k_w, k_b = jax.random.split(key)
    bound = 1.0 / math.sqrt(dim)
    weight = jax.random.uniform(k_w, (dim, dim), jnp.float32, -bound, bound)
    bias = jax.random.uniform(k_b, (dim,), jnp.float32, -bound, bound)
    return {"weight": weight, "bias": bias}


# ----------------------------- pure-JAX reference --------------------------- #

def ref_mlp_block(x, weight, bias):
    y = jnp.einsum("...i,oi->...o", x, weight) + bias
    y = jnp.maximum(y, 0.0)
    return y + x


# ----------------------------- main ----------------------------------------- #

if __name__ == "__main__":
    key = jax.random.PRNGKey(0)
    kx, kp = jax.random.split(key)

    batch, seq, dim = 2, 16, 32
    x = jax.random.normal(kx, (batch, seq, dim), jnp.float32)
    params = init_params(kp, dim)

    out = mlp_block(x, params["weight"], params["bias"])
    out = jax.block_until_ready(out)

    ref = ref_mlp_block(x, params["weight"], params["bias"])
    assert out.shape == x.shape
    assert jnp.allclose(out, ref, atol=1e-5, rtol=1e-5)

    print("KERNEL_OK")
</pallas_src>

<mosaic_0001>
module attributes {stable_mosaic.version = 11 : i64} {
  func.func @_mlp_block_kernel(%arg0: i32, %arg1: memref<32x128xf32, #tpu.memory_space<vmem>>, %arg2: memref<128x128xf32, #tpu.memory_space<vmem>>, %arg3: memref<1x128xf32, #tpu.memory_space<vmem>>, %arg4: memref<32x128xf32, #tpu.memory_space<vmem>>) attributes {dimension_semantics = [#tpu.dimension_semantics<parallel>], iteration_bounds = array<i64: 1>, scalar_prefetch = 0 : i64, scratch_operands = 0 : i64, tpu.core_type = #tpu.core_type<tc>, window_params = [{transform_indices = @transform_0, window_bounds = array<i64: 32, 128>}, {pipeline_mode = #tpu.pipeline_mode<synchronous>, transform_indices = @transform_1, window_bounds = array<i64: 128, 128>}, {pipeline_mode = #tpu.pipeline_mode<synchronous>, transform_indices = @transform_2, window_bounds = array<i64: 1, 128>}, {transform_indices = @transform_3, window_bounds = array<i64: 32, 128>}]} {
    %c0 = arith.constant 0 : index
    %c0_0 = arith.constant 0 : index
    %0 = vector.load %arg1[%c0, %c0_0] : memref<32x128xf32, #tpu.memory_space<vmem>>, vector<32x128xf32>
    %c0_1 = arith.constant 0 : index
    %c0_2 = arith.constant 0 : index
    %1 = vector.load %arg2[%c0_1, %c0_2] : memref<128x128xf32, #tpu.memory_space<vmem>>, vector<128x128xf32>
    %cst = arith.constant dense<0.000000e+00> : vector<32x128xf32>
    %2 = tpu.matmul %0, %1, %cst {dimension_numbers = #tpu.dot_dimension_numbers<[1], [0], [0], [1], [0, 0, 1, 1], [], []>} : vector<32x128xf32>, vector<128x128xf32>, vector<32x128xf32> -> vector<32x128xf32>
    %c0_3 = arith.constant 0 : index
    %c0_4 = arith.constant 0 : index
    %3 = vector.load %arg3[%c0_3, %c0_4] : memref<1x128xf32, #tpu.memory_space<vmem>>, vector<1x128xf32>
    %4 = vector.broadcast %3 : vector<1x128xf32> to vector<32x128xf32>
    %5 = arith.addf %2, %4 : vector<32x128xf32>
    %cst_5 = arith.constant 0.000000e+00 : f32
    %6 = vector.broadcast %cst_5 : f32 to vector<32x128xf32>
    %7 = arith.maximumf %5, %6 : vector<32x128xf32>
    %8 = arith.addf %7, %0 : vector<32x128xf32>
    %c0_6 = arith.constant 0 : index
    %c0_7 = arith.constant 0 : index
    %9 = vector.load %arg4[%c0_6, %c0_7] : memref<32x128xf32, #tpu.memory_space<vmem>>, vector<32x128xf32>
    tpu.vector_store %arg4[%c0_6, %c0_7], %8 {strides = array<i32>} : memref<32x128xf32, #tpu.memory_space<vmem>>, vector<32x128xf32>,
    return
  }
  func.func @transform_0(%arg0: i32) -> (i32, i32) {
    %c0_i32 = arith.constant 0 : i32
    %c0_i32_0 = arith.constant 0 : i32
    return %arg0, %c0_i32 : i32, i32
  }
  func.func @transform_1(%arg0: i32) -> (i32, i32) {
    %c0_i32 = arith.constant 0 : i32
    %c0_i32_0 = arith.constant 0 : i32
    %c0_i32_1 = arith.constant 0 : i32
    return %c0_i32, %c0_i32_0 : i32, i32
  }
  func.func @transform_2(%arg0: i32) -> (i32, i32) {
    %c0_i32 = arith.constant 0 : i32
    %c0_i32_0 = arith.constant 0 : i32
    %c0_i32_1 = arith.constant 0 : i32
    return %c0_i32, %c0_i32_0 : i32, i32
  }
  func.func @transform_3(%arg0: i32) -> (i32, i32) {
    %c0_i32 = arith.constant 0 : i32
    %c0_i32_0 = arith.constant 0 : i32
    return %arg0, %c0_i32 : i32, i32
  }
}

</mosaic_0001>

<bundles_post_ra>
// kernel: tpu_custom_call.1
= control target key start
LH: loop header
LB: loop body
LE: loop exit
PB: predicated region body
PF: predicated region fallthrough
CT: control target
= control target key end

     0   :  { %8 = vsyncpa [#allocation3], 0  ;;  %s393_s0 = inlined_call_operand.hbm [shape: f32[32,128], index: 0, kind: input, shape index: {}]   ;;  %s394_s1 = inlined_call_operand.hbm [shape: f32[128,128], index: 1, kind: input, shape index: {}]   ;;  %s395_s2 = inlined_call_operand.vmem [shape: f32[1,128], index: 2, kind: input, shape index: {}]   ;;  %s396_s3 = inlined_call_operand.hbm [shape: f32[32,128], index: 3, kind: output, shape index: {}]  }
   0x1   :  { %9 = vsyncpa [#allocation6], 0 }
   0x2   :  { %10 = vsyncpa [#allocation4], 0  ;;  %s347_s12 = smov [#allocation2]  }
   0x3   :  { %s16_s13 = sshll.u32 %s347_s12, 4  ;;  %s17_s13 = int_to_ptr.vmem [resolvable:$true] %s16_s13 }
   0x4   :  { %s289_s14 = scalar_lea.vmem %s17_s13, 512  ;;  %p294_p1 = scmp.lt.s32.totalorder %s17_s13, %s17_s13 }
   0x5   :  { %p290_p0 = scmp.ne.s32.totalorder %s17_s13, %s289_s14  ;;  %p295_p2 = scmp.lt.s32.totalorder %s289_s14, %s289_s14 }
   0x7   :  { %p296_p3 = por %p295_p2, %p294_p1 }
   0x9   :  { %p297_p4 = pnand %p296_p3, %p290_p0 }
   0xb   :  { %300 = shalt.err (!%p297_p4)
}
   0xc   :  { %s348_s15 = smov 128   ;;  %s349_s16 = smov 8  }
   0xd   :  { %22 = dma.hbm_to_vmem [thread:$0]  %s393_s0, 512, %s17_s13, [#allocation3], %s348_s15, %s348_s15, %s349_s16  }
   0xe   :  { %s350_s19 = smov [#allocation5]  }
   0xf   :  { %s28_s20 = sshll.u32 %s350_s19, 4  ;;  %s29_s20 = int_to_ptr.vmem [resolvable:$true] %s28_s20 }
  0x10   :  { %s309_s21 = scalar_lea.vmem %s29_s20, 2048  ;;  %p314_p6 = scmp.lt.s32.totalorder %s29_s20, %s29_s20 }
  0x11   :  { %p310_p5 = scmp.ne.s32.totalorder %s29_s20, %s309_s21  ;;  %p315_p7 = scmp.lt.s32.totalorder %s309_s21, %s309_s21 }
  0x13   :  { %p316_p8 = por %p315_p7, %p314_p6 }
  0x15   :  { %p317_p9 = pnand %p316_p8, %p310_p5 }
  0x17   :  { %320 = shalt.err (!%p317_p9)
}
  0x18   :  { %34 = dma.hbm_to_vmem [thread:$0]  %s394_s1, 2048, %s29_s20, [#allocation6], %s348_s15, %s348_s15, %s349_s16  }
  0x19   :  { %341 = dma.done.wait [#allocation3], 512  }
  0x1a   :  { %342 = vsyncadd [#allocation3], 4294966784 }
  0x1b   :  { %343 = dma.done.wait [#allocation6], 2048  }
  0x1c   :  { %344 = vsyncadd [#allocation6], 4294965248  ;;  %v62_v0 = vld [vmem:[#allocation5 + $0x78] sm:$0xff]  ;;  %v61_v1 = vld [vmem:[#allocation5 + $0x70] sm:$0xff]  ;;  %s351_s24 = smov [#allocation7]  }
  0x1d   :  { %206 = vmatprep.subr.mxu0 %v62_v0  ;;  %244 = vmatprep.subr.mxu1 %v62_v0  ;;  %v60_v2 = vld [vmem:[#allocation5 + $0x68] sm:$0xff]  ;;  %v59_v3 = vld [vmem:[#allocation5 + $0x60] sm:$0xff]  ;;  %v58_v4 = vld [vmem:[#allocation5 + $0x58] sm:$0xff]  ;;  %s172_s25 = sshll.u32 %s351_s24, 4  ;;  %s173_s25 = int_to_ptr.vmem [resolvable:$true] %s172_s25 }
  0x1e   :  { %207 = vmatpush3.msra.mxu0 %v62_v0  ;;  %260 = vmatpush3.msra.mxu1 %v62_v0  ;;  %v57_v5 = vld [vmem:[#allocation5 + $0x50] sm:$0xff]  ;;  %v56_v6 = vld [vmem:[#allocation5 + $0x48] sm:$0xff]  ;;  %v55_v7 = vld [vmem:[#allocation5 + $0x40] sm:$0xff]  ;;  %p326_p11 = scmp.lt.s32.totalorder %s173_s25, %s173_s25 }
  0x1f   :  { %208 = vmatprep.subr.mxu0 %v61_v1  ;;  %245 = vmatprep.subr.mxu1 %v61_v1  ;;  %v54_v8 = vld [vmem:[#allocation5 + $0x38] sm:$0xff]  ;;  %v53_v9 = vld [vmem:[#allocation5 + $0x30] sm:$0xff]  ;;  %v52_v10 = vld [vmem:[#allocation5 + $0x28] sm:$0xff] }
  0x20   :  { %209 = vmatpush3.msra.mxu0 %v61_v1  ;;  %261 = vmatpush3.msra.mxu1 %v61_v1  ;;  %v51_v11 = vld [vmem:[#allocation5 + $0x20] sm:$0xff]  ;;  %v50_v12 = vld [vmem:[#allocation5 + $0x18] sm:$0xff]  ;;  %v49_v13 = vld [vmem:[#allocation5 + $0x10] sm:$0xff] }
  0x21   :  { %210 = vmatprep.subr.mxu0 %v60_v2  ;;  %246 = vmatprep.subr.mxu1 %v60_v2  ;;  %v48_v14 = vld [vmem:[#allocation5 + $0x8] sm:$0xff]  ;;  %v47_v15 = vld [vmem:[#allocation5] sm:$0xff]  ;;  %v45_v17 = vld [vmem:[#allocation2 + $0x10] sm:$0xff] }
  0x22   :  { %211 = vmatpush3.msra.mxu0 %v60_v2  ;;  %262 = vmatpush3.msra.mxu1 %v60_v2  ;;  %v43_v16 = vld [vmem:[#allocation2] sm:$0xff]  ;;  %v44_v18 = vld [vmem:[#allocation2 + $0x8] sm:$0xff]  ;;  %v46_v19 = vld [vmem:[#allocation2 + $0x18] sm:$0xff] }
  0x23   :  { %212 = vmatprep.subr.mxu0 %v59_v3  ;;  %247 = vmatprep.subr.mxu1 %v59_v3  ;;  %v185_v20 = vld [vmem:[%s395_s2] ss:$0 sm:$0xff]  ;;  %s321_s2 = scalar_lea.vmem %s173_s25, 512 }
  0x24   :  { %213 = vmatpush3.msra.mxu0 %v59_v3  ;;  %263 = vmatpush3.msra.mxu1 %v59_v3  ;;  %p322_p10 = scmp.ne.s32.totalorder %s173_s25, %s321_s2  ;;  %p327_p12 = scmp.lt.s32.totalorder %s321_s2, %s321_s2 }
  0x25   :  { %214 = vmatprep.subr.mxu0 %v58_v4  ;;  %248 = vmatprep.subr.mxu1 %v58_v4 }
  0x26   :  { %215 = vmatpush3.msra.mxu0 %v58_v4  ;;  %264 = vmatpush3.msra.mxu1 %v58_v4  ;;  %p328_p13 = por %p327_p12, %p326_p11 }
  0x27   :  { %216 = vmatprep.subr.mxu0 %v57_v5  ;;  %249 = vmatprep.subr.mxu1 %v57_v5 }
  0x28   :  { %217 = vmatpush3.msra.mxu0 %v57_v5  ;;  %265 = vmatpush3.msra.mxu1 %v57_v5  ;;  %p329_p0 = pnand %p328_p13, %p322_p10 }
  0x29   :  { %218 = vmatprep.subr.mxu0 %v56_v6  ;;  %250 = vmatprep.subr.mxu1 %v56_v6 }
  0x2a   :  { %219 = vmatpush3.msra.mxu0 %v56_v6  ;;  %266 = vmatpush3.msra.mxu1 %v56_v6 }
  0x2b   :  { %220 = vmatprep.subr.mxu0 %v55_v7  ;;  %251 = vmatprep.subr.mxu1 %v55_v7 }
  0x2c   :  { %221 = vmatpush3.msra.mxu0 %v55_v7  ;;  %267 = vmatpush3.msra.mxu1 %v55_v7 }
  0x2d   :  { %222 = vmatprep.subr.mxu0 %v54_v8  ;;  %252 = vmatprep.subr.mxu1 %v54_v8 }
  0x2e   :  { %223 = vmatpush3.msra.mxu0 %v54_v8  ;;  %268 = vmatpush3.msra.mxu1 %v54_v8 }
  0x2f   :  { %224 = vmatprep.subr.mxu0 %v53_v9  ;;  %253 = vmatprep.subr.mxu1 %v53_v9 }
  0x30   :  { %225 = vmatpush3.msra.mxu0 %v53_v9  ;;  %269 = vmatpush3.msra.mxu1 %v53_v9 }
  0x31   :  { %226 = vmatprep.subr.mxu0 %v52_v10  ;;  %254 = vmatprep.subr.mxu1 %v52_v10 }
  0x32   :  { %227 = vmatpush3.msra.mxu0 %v52_v10  ;;  %270 = vmatpush3.msra.mxu1 %v52_v10 }
  0x33   :  { %228 = vmatprep.subr.mxu0 %v51_v11  ;;  %255 = vmatprep.subr.mxu1 %v51_v11 }
  0x34   :  { %229 = vmatpush3.msra.mxu0 %v51_v11  ;;  %271 = vmatpush3.msra.mxu1 %v51_v11 }
  0x35   :  { %230 = vmatprep.subr.mxu0 %v50_v12  ;;  %256 = vmatprep.subr.mxu1 %v50_v12 }
  0x36   :  { %231 = vmatpush3.msra.mxu0 %v50_v12  ;;  %272 = vmatpush3.msra.mxu1 %v50_v12 }
  0x37   :  { %232 = vmatprep.subr.mxu0 %v49_v13  ;;  %257 = vmatprep.subr.mxu1 %v49_v13 }
  0x38   :  { %233 = vmatpush3.msra.mxu0 %v49_v13  ;;  %273 = vmatpush3.msra.mxu1 %v49_v13 }
  0x39   :  { %234 = vmatprep.subr.mxu0 %v48_v14  ;;  %258 = vmatprep.subr.mxu1 %v48_v14 }
  0x3a   :  { %235 = vmatpush3.msra.mxu0 %v48_v14  ;;  %274 = vmatpush3.msra.mxu1 %v48_v14 }
  0x3b   :  { %236 = vmatprep.subr.mxu0 %v47_v15  ;;  %259 = vmatprep.subr.mxu1 %v47_v15 }
  0x3c   :  { %237 = vmatpush3.msra.mxu0 %v47_v15  ;;  %275 = vmatpush3.msra.mxu1 %v47_v15 }
  0x3d   :  { %238 = vmatprep.mubr.f32.mxu0 %v43_v16  ;;  %241 = vmatprep.mubr.f32.mxu1 %v45_v17 }
  0x3e   :  { %239 = vmatmul.mubr.f32.vlgmr.msra.gmra.mxu0 %v44_v18  ;;  %242 = vmatmul.mubr.f32.vlgmr.msra.gmra.mxu1 %v46_v19 }
  0xfe   :  { %v240_v21 = vpop.f32.mrf.mxu0  ;;  %v243_v22 = vpop.f32.mrf.mxu1 }
  0xff   :  { %v142_v23 = vadd.f32 %v240_v21, %v185_v20  ;;  %v152_v24 = vadd.f32 %v243_v22, %v185_v20 }
 0x100   :  { %v136_v25 = vpop.f32.mrf.mxu0  ;;  %v146_v26 = vpop.f32.mrf.mxu1 }
 0x101   :  { %v156_v27 = vmax.f32 %v142_v23, 0.0  ;;  %v158_v28 = vmax.f32 %v152_v24, 0.0  ;;  %v137_v29 = vadd.f32 %v185_v20, %v136_v25  ;;  %v147_v30 = vadd.f32 %v185_v20, %v146_v26 }
 0x103   :  { %v160_v31 = vadd.f32 %v156_v27, %v44_v18  ;;  %v162_v32 = vadd.f32 %v158_v28, %v46_v19  ;;  %v155_v33 = vmax.f32 %v137_v29, 0.0  ;;  %v157_v34 = vmax.f32 %v147_v30, 0.0 }
 0x105   :  { %164 = vst [vmem:[#allocation7 + $0x8] sm:$0xff] %v160_v31  ;;  %166 = vst [vmem:[#allocation7 + $0x18] sm:$0xff] %v162_v32  ;;  %v159_v35 = vadd.f32 %v155_v33, %v43_v16  ;;  %v161_v36 = vadd.f32 %v157_v34, %v45_v17 }
 0x107   :  { %163 = vst [vmem:[#allocation7] sm:$0xff] %v159_v35  ;;  %165 = vst [vmem:[#allocation7 + $0x10] sm:$0xff] %v161_v36 }
 0x108   :  { %332 = shalt.err (!%p329_p0)
}
 0x109   :  { %178 = dma.vmem_to_hbm [thread:$0]  %s173_s25, 512, %s396_s3, [#allocation4], %s348_s15, %s348_s15, %s349_s16  }
 0x10a   :  { %345 = dma.done.wait [#allocation4], 512  }
 0x10b   :  { %346 = vsyncadd [#allocation4], 4294966784 }
 0x10c   :  { %182 = vsyncpa [#allocation3], 1 }
 0x10d   :  { %183 = vsyncpa [#allocation6], 1 }
 0x10e   :  { %184 = vsyncpa [#allocation4], 1 }

</bundles_post_ra>
